<compile_context>
chip_gen: v7x
topology: tpu7x:2x2x1
jax: 0.10.0
libtpu: 0.0.40
codegen_flags: <defaults>
</compile_context>

<pallas_src>
import jax
import jax.numpy as jnp
from jax.experimental import pallas as pl
from jax.experimental.pallas import tpu as pltpu


def _channel_softmax_kernel(x_ref, o_ref):
    # Block shape (after Squeezed batch dim): (C, TILE). Reduce over axis 0.
    x = x_ref[...].astype(jnp.float32)
    m = jnp.max(x, axis=0, keepdims=True)
    e = jnp.exp(x - m)
    s = jnp.sum(e, axis=0, keepdims=True)
    inv = 1.0 / s                      # hoisted: one divide per column, not per element
    o_ref[...] = (e * inv).astype(o_ref.dtype)


def _round_up(v, m):
    return ((v + m - 1) // m) * m


def _vmem_capacity_bytes():
    """Physical per-core VMEM; conservative fallback if the query fails."""
    try:
        info = pltpu.get_tpu_info()
        cap = int(getattr(info, "vmem_capacity_bytes", 0) or 0)
        if cap >= 16 * 1024 * 1024:
            return cap
    except Exception:
        pass
    return 64 * 1024 * 1024            # smallest current generation (v7x per-TC)


def _pick_lane_tile(C, N, dtype, batch, vmem_budget_bytes, max_block_bytes,
                    min_grid_steps=8):
    """Largest lane tile (multiple of 128) satisfying VMEM + parallelism caps.

    VMEM accounting per resident grid step (per lane of the tile):
      * 2x double-buffered input block + 2x output block, with C rounded up to
        the sublane packing of the io dtype (8 rows for f32, 16 for bf16), and
      * ~3 full-block f32 temporaries (upcast x, e, pre-downcast result) that
        Mosaic materializes for blocks far larger than the 256 KiB vreg file.
    The estimate is kept under half of `vmem_budget_bytes` for headroom.
    """
    itemsize = jnp.dtype(dtype).itemsize
    n_pad = _round_up(N, 128)
    c_pad_io = _round_up(C, max(8, 32 // itemsize))
    c_pad_f32 = _round_up(C, 8)
    bytes_per_lane = 4 * c_pad_io * itemsize + 3 * c_pad_f32 * 4

    cap_vmem = (vmem_budget_bytes // 2) // bytes_per_lane
    cap_block = max_block_bytes // (c_pad_io * itemsize)
    # Megacore (v7x): keep >= min_grid_steps total grid steps when possible.
    tiles_needed = max(1, -(-min_grid_steps // max(1, batch)))
    cap_parallel = max(1, n_pad // tiles_needed)

    tile = min(cap_vmem, cap_block, cap_parallel, n_pad)
    tile = max(128, (tile // 128) * 128)
    tile = min(tile, n_pad)

    # Prefer a tile that evenly divides the padded extent (no masked remainder
    # store — keeps every store an unmasked, lane-dense vst), unless that would
    # shrink the tile by more than 2x.
    n_lanes = n_pad // 128
    t_lanes = tile // 128
    best = 1
    for d in range(t_lanes, 0, -1):
        if n_lanes % d == 0:
            best = d
            break
    if best * 2 >= t_lanes:
        tile = best * 128
    return tile


def lambda_forward(x):
    """Pallas equivalent of Lambda(fn=softmax over channels).forward(x).

    Args:
      x: (B, C, T, H, W) array (PyTorch NCTHW convention).
    Returns:
      (B, C, T, H, W) array, fn applied independently per time step.
    """
    B, C, T, H, W = x.shape
    N = T * H * W
    # Free, contiguous reshape — no HBM data movement.
    x2 = x.reshape(B, C, N)

    itemsize = jnp.dtype(x.dtype).itemsize
    vmem_cap = _vmem_capacity_bytes()
    # Scoped-VMEM budget with ~3/8 physical headroom:
    #   v5e/v6e (128 MiB) -> 80 MiB limit; v7x (64 MiB) -> 40 MiB limit.
    vmem_budget = min((vmem_cap * 5) // 8, 96 * 1024 * 1024)
    # Per-generation block cap: ~4 MiB on 64 MiB-VMEM chips, ~8 MiB otherwise.
    max_block_bytes = (4 * 1024 * 1024 if vmem_cap <= 64 * 1024 * 1024
                       else 8 * 1024 * 1024)

    tile = _pick_lane_tile(C, N, x.dtype, B, vmem_budget, max_block_bytes)
    grid = (B, pl.cdiv(N, tile))

    total = B * C * N
    cost = pl.CostEstimate(
        flops=5 * total,                     # max/sub/sum/mul per element
        transcendentals=total + B * N,       # exp per element + recip per column
        bytes_accessed=2 * total * itemsize)

    out = pl.pallas_call(
        _channel_softmax_kernel,
        out_shape=jax.ShapeDtypeStruct((B, C, N), x.dtype),
        grid=grid,
        in_specs=[pl.BlockSpec((pl.Squeezed(), C, tile), lambda b, n: (b, 0, n))],
        out_specs=pl.BlockSpec((pl.Squeezed(), C, tile), lambda b, n: (b, 0, n)),
        compiler_params=pltpu.CompilerParams(
            dimension_semantics=("parallel", "parallel"),
            vmem_limit_bytes=int(vmem_budget)),
        cost_estimate=cost,
    )(x2)

    # Free, contiguous reshape back to NCTHW.
    return out.reshape(B, C, T, H, W)


def lambda_forward_reference(x):
    """Pure-JAX mirror of the PyTorch loop: stack([fn(x[:, :, t])], dim=2)."""
    def fn(step):  # step: (B, C, H, W) -> softmax over dim=1
        return jax.nn.softmax(step, axis=1)
    steps = [fn(x[:, :, t]) for t in range(x.shape[2])]
    return jnp.stack(steps, axis=2)


# TODO(synk): forward_step / forward_steps streaming call modes and arbitrary
# user-supplied `fn` objects are not representable as a fixed Pallas kernel;
# this implements the `forward` path with a representative per-step channel
# softmax.

if __name__ == "__main__":
    key = jax.random.PRNGKey(0)
    B, C, T, H, W = 2, 4, 8, 8, 8
    x = jax.random.normal(key, (B, C, T, H, W), dtype=jnp.float32)

    y = lambda_forward(x)
    y = jax.block_until_ready(y)

    y_ref = lambda_forward_reference(x)
    assert y.shape == (B, C, T, H, W)
    assert jnp.allclose(y, y_ref, atol=1e-5, rtol=1e-5)

    print("KERNEL_OK")
</pallas_src>

<mosaic_0001>
module attributes {stable_mosaic.version = 11 : i64} {
  func.func @_channel_softmax_kernel(%arg0: i32, %arg1: i32, %arg2: memref<1x4x128xf32, #tpu.memory_space<vmem>>, %arg3: memref<1x4x128xf32, #tpu.memory_space<vmem>>) attributes {dimension_semantics = [#tpu.dimension_semantics<parallel>, #tpu.dimension_semantics<parallel>], iteration_bounds = array<i64: 2, 4>, scalar_prefetch = 0 : i64, scratch_operands = 0 : i64, tpu.core_type = #tpu.core_type<tc>, window_params = [{transform_indices = @transform_0, window_bounds = array<i64: 1, 4, 128>}, {transform_indices = @transform_1, window_bounds = array<i64: 1, 4, 128>}]} {
    %c0 = arith.constant 0 : index
    %c0_0 = arith.constant 0 : index
    %c0_1 = arith.constant 0 : index
    %0 = vector.load %arg2[%c0, %c0_0, %c0_1] : memref<1x4x128xf32, #tpu.memory_space<vmem>>, vector<1x4x128xf32>
    %1 = vector.shape_cast %0 : vector<1x4x128xf32> to vector<4x128xf32>
    %cst = arith.constant dense<0xFF800000> : vector<128xf32>
    %2 = vector.multi_reduction <maximumf>, %1, %cst [0] : vector<4x128xf32> to vector<128xf32>
    %3 = vector.shape_cast %2 : vector<128xf32> to vector<1x128xf32>
    %4 = vector.broadcast %3 : vector<1x128xf32> to vector<4x128xf32>
    %5 = arith.subf %1, %4 : vector<4x128xf32>
    %6 = math.exp %5 : vector<4x128xf32>
    %cst_2 = arith.constant dense<0.000000e+00> : vector<128xf32>
    %7 = vector.multi_reduction <add>, %6, %cst_2 [0] : vector<4x128xf32> to vector<128xf32>
    %8 = vector.shape_cast %7 : vector<128xf32> to vector<1x128xf32>
    %cst_3 = arith.constant 1.000000e+00 : f32
    %9 = vector.broadcast %cst_3 : f32 to vector<1x128xf32>
    %10 = arith.divf %9, %8 : vector<1x128xf32>
    %11 = vector.broadcast %10 : vector<1x128xf32> to vector<4x128xf32>
    %12 = arith.mulf %6, %11 : vector<4x128xf32>
    %c0_4 = arith.constant 0 : index
    %c0_5 = arith.constant 0 : index
    %c0_6 = arith.constant 0 : index
    %13 = vector.load %arg3[%c0_4, %c0_5, %c0_6] : memref<1x4x128xf32, #tpu.memory_space<vmem>>, vector<1x4x128xf32>
    %14 = vector.shape_cast %13 : vector<1x4x128xf32> to vector<4x128xf32>
    %15 = vector.shape_cast %12 : vector<4x128xf32> to vector<1x4x128xf32>
    tpu.vector_store %arg3[%c0_4, %c0_5, %c0_6], %15 {strides = array<i32>} : memref<1x4x128xf32, #tpu.memory_space<vmem>>, vector<1x4x128xf32>,
    return
  }
  func.func @transform_0(%arg0: i32, %arg1: i32) -> (i32, i32, i32) {
    %c0_i32 = arith.constant 0 : i32
    %c0_i32_0 = arith.constant 0 : i32
    return %arg0, %c0_i32, %arg1 : i32, i32, i32
  }
  func.func @transform_1(%arg0: i32, %arg1: i32) -> (i32, i32, i32) {
    %c0_i32 = arith.constant 0 : i32
    %c0_i32_0 = arith.constant 0 : i32
    return %arg0, %c0_i32, %arg1 : i32, i32, i32
  }
}

</mosaic_0001>

<bundles_post_ra>
// kernel: tpu_custom_call.1
= control target key start
LH: loop header
LB: loop body
LE: loop exit
PB: predicated region body
PF: predicated region fallthrough
CT: control target
= control target key end

     0   :  { %6 = vsyncpa [#allocation3], 0  ;;  %s707_s0 = inlined_call_operand.hbm [shape: f32[2,4,512], index: 0, kind: input, shape index: {}]   ;;  %s708_s1 = inlined_call_operand.hbm [shape: f32[2,4,512], index: 1, kind: output, shape index: {}]  }
   0x1   :  { %8 = vsyncpa [#allocation3 + $0x1], 0 }
   0x2   :  { %9 = vsyncpa [#allocation4], 0 }
   0x3   :  { %11 = vsyncpa [#allocation4 + $0x1], 0  ;;  %s513_s6 = smov 0   ;;  %s515_s7 = smov 0  }
   0x4   :  { %s517_s8 = smov 0   ;;  %s519_s9 = smov 0  }
   0x5   :  { %s521_s10 = smov 0   ;;  %s523_s11 = smov 0  }
   0x6   :  { %s525_s12 = smov 0   ;;  %s527_s13 = smov 0  }
   0x7 LB: > { %s274_s14 = sadd.s32 4294967295, %s499_s13   ;;  %s275_s15 = sadd.s32 4294967294, %s499_s13   ;;  %s499_s13 = sphi %s527_s13, %s17_s13   ;;  %s495_s12 = sphi %s525_s12, %s725_s12   ;;  %s491_s11 = sphi %s523_s11, %s724_s11   ;;  %s487_s10 = sphi %s521_s10, %s723_s10   ;;  %s483_s9 = sphi %s519_s9, %s722_s9   ;;  %s479_s8 = sphi %s517_s8, %s721_s8   ;;  %s475_s7 = sphi %s515_s7, %s720_s7   ;;  %s471_s6 = sphi %s513_s6, %s719_s6  }
   0x8   : > { %s26_s16 = sadd.s32 1, %s491_s11  ;;  %s29_s17 = sadd.s32 1, %s495_s12 }
   0x9   : > { %p27_p0 = scmp.ge.s32.totalorder %s26_s16, 4  ;;  %s38_s18 = sadd.s32 1, %s479_s8 }
   0xa   : > { %p45_p1 = scmp.ne.s32.totalorder %s479_s8, %s475_s7  ;;  %p46_p2 = scmp.eq.s32.totalorder %s499_s13, 0 }
   0xb   : > { %s727_s16 = smov (%p27_p0, %s26_s16), 0  ;;  %s729_s17 = smov (!%p27_p0, %s29_s17), %s495_s12 }
   0xc   : > { %s34_s19 = ssub.s32 %s491_s11, %s727_s16  ;;  %p566_p3 = por %p46_p2, %p45_p1 }
   0xd   : > { %p31_p4 = scmp.ge.s32.totalorder %s729_s17, 2  ;;  %p51_p5 = scmp.ne.s32.totalorder %s475_s7, %s471_s6 }
   0xe   : > { %p52_p6 = scmp.eq.s32.totalorder %s274_s14, 0  ;;  %p77_p7 = scmp.eq.s32.totalorder %s274_s14, 7 }
   0xf   : > { %s731_s17 = smov (%p31_p4, %s729_s17), 0  ;;  %p83_p10 = scmp.eq.s32.totalorder %s275_s15, 7 }
  0x10   : > { %p574_p8 = por %p52_p6, %p51_p5  ;;  %p578_p9 = por %p77_p7, %p45_p1 }
  0x11   : > { %s33_s23 = ssub.s32 %s495_s12, %s731_s17  ;;  %p584_p12 = por %p83_p10, %p51_p5 }
  0x12   : > { %s712_s22 = scalar_select %p578_p9, 1, 0 }
  0x13   : > { %s35_s24 = sor.u32 %s34_s19, %s33_s23  ;;  %p301_p13 = scmp.lt.s32.totalorder %s499_s13, 8 }
  0x14   : > { %p36_p11 = scmp.eq.s32.totalorder %s35_s24, 0  ;;  %s103_s26 = sand.u32 1, %s479_s8  }
  0x15   : > { %s713_s25 = scalar_select %p584_p12, 1, 0 }
  0x16   : > { %s591_s27 = scalar_select %p36_p11, %s479_s8, %s38_s18  }
  0x17   : > { %s278_s28 = sshll.u32 %s103_s26, 2  ;;  %s279_s29 = sshll.u32 %s495_s12, 2 }
  0x18   : > { %s112_s30 = sadd.s32 %s491_s11, %s279_s29  ;;  %s107_s2 = scalar_lea.vmem [#allocation2], %s278_s28 }
  0x19   : > { %s116_s3 = sshll.u32 %s107_s2, 4  ;;  %s280_s4 = sshll.u32 %s112_s30, 6  ;;  %s595_s3 = int_to_ptr.vmem [resolvable:$true] %s116_s3 }
  0x1a   : > { %s600_s15 = scalar_lea.hbm %s707_s0, %s280_s4  ;;  %p604_p0 = pnand %p301_p13, %p566_p3 }
  0x1b   : > { %s104_s19 = scalar_lea.sflag [#allocation3], %s103_s26  ;;  %s371_s23 = scalar_lea.hbm %s600_s15, 64 }
  0x1c   : > { %p372_p4 = scmp.ne.s32.totalorder %s600_s15, %s371_s23  ;;  %p373_p5 = pneg %p604_p0 }
  0x1d   : > { %s376_s28 = scalar_lea.hbm %s707_s0, 512  ;;  %p377_p3 = scmp.lt.u32.totalorder %s600_s15, %s707_s0 }
  0x1e   : > { %p374_p6 = pnand %p373_p5, %p372_p4  ;;  %p378_p10 = scmp.lt.u32.totalorder %s376_s28, %s371_s23 }
  0x1f   : > { %p380_p13 = scmp.lt.u32.totalorder %s371_s23, %s600_s15 }
  0x20   : > { %p375_p7 = pneg %p374_p6  ;;  %p379_p11 = por %p378_p10, %p377_p3 }
  0x22   : > { %p381_p1 = por %p380_p13, %p379_p11 }
  0x24   : > { %p382_p2 = pnand %p381_p1, %p375_p7 }
  0x26   : > { %385 = shalt.err (!%p382_p2)
}
  0x27   : > { %s386_s26 = scalar_lea.vmem %s595_s3, 64  ;;  %s501_s2 = smov [#allocation2]  }
  0x28   : > { %p387_p4 = scmp.ne.s32.totalorder %s595_s3, %s386_s26  ;;  %s391_s4 = sshll.u32 %s501_s2, 4  ;;  %s392_s4 = int_to_ptr.vmem [resolvable:$false] %s391_s4 }
  0x29   : > { %s393_s5 = scalar_lea.vmem %s392_s4, 128  ;;  %p394_p9 = scmp.lt.s32.totalorder %s595_s3, %s392_s4 }
  0x2a   : > { %p389_p6 = pnand %p387_p4, %p373_p5  ;;  %p395_p3 = scmp.lt.s32.totalorder %s393_s5, %s386_s26 }
  0x2c   : > { %p390_p12 = pneg %p389_p6  ;;  %p396_p10 = por %p395_p3, %p394_p9 }
  0x2e   : > { %p397_p11 = pnand %p396_p10, %p390_p12 }
  0x30   : > { %400 = shalt.err (!%p397_p11)
}
  0x31   : > { %296 = dma.hbm_to_vmem [thread:$0]  (!%p604_p0), %s600_s15, 64, %s595_s3, %s104_s19  }
  0x32   : > { %p715_p1 = scmp.lt.s32.totalorder %s499_s13, 9  ;;  %p716_p2 = scmp.ge.s32.totalorder %s499_s13, 1 }
  0x34   : > { %p122_p5 = pnand %p716_p2, %p715_p1 }
  0x35   : > { %s640_s14 = sand.u32 (!%p122_p5), 1, %s475_s7  }
  0x36   : > { %125 = sbr.rel (%p122_p5) target bundleno = 131 (0x83), region = 24  ;;  %s282_s23 = sshll.u32 (!%p122_p5), %s640_s14, 2 }
  0x37   : > { %s128_s20 = scalar_lea.sflag (!%p122_p5), [#allocation3], %s640_s14  ;;  %s131_s24 = scalar_lea.vmem (!%p122_p5), [#allocation2], %s282_s23 }
  0x3d   : > { %462 = dma.done.wait (%p574_p8), %s128_s20, 64  }
  0x3e   : > { %464 = vsyncadd (%p574_p8), %s128_s20, 4294967232  ;;  %vm151_vm0 = vcmask 1043456   ;;  %v150_v0 = vld [vmem:[%s131_s24] sm:$0xf]  ;;  %s285_s21 = sshll.u32 %s487_s10, 2  ;;  %s149_s15 = scalar_lea.vmem [#allocation5], %s282_s23 }
  0x3f   : > { %v152_v1 = vsel %vm151_vm0, %v150_v0, -inf  ;;  %s185_s3 = sadd.s32 %s483_s9, %s285_s21  ;;  %s189_s18 = sshll.u32 %s149_s15, 4  ;;  %s650_s18 = int_to_ptr.vmem [resolvable:$true] %s189_s18 }
  0x40   : > { %v153_v2 = vrot.slane %v152_v1, 4  ;;  %s286_s19 = sshll.u32 %s185_s3, 6  ;;  %s174_s26 = scalar_lea.sflag [#allocation4], %s640_s14 }
  0x41   : > { %s655_s30 = scalar_lea.hbm %s708_s1, %s286_s19  ;;  %s401_s2 = scalar_lea.vmem %s650_s18, 64 }
  0x42   : > { %v154_v3 = vmax.f32 %v152_v1, %v153_v2  ;;  %p402_p8 = scmp.ne.s32.totalorder %s650_s18, %s401_s2  ;;  %p717_p9 = scmp.ne.s32.totalorder %s712_s22, 0 }
  0x43   : > { %s502_s9 = smov [#allocation5]  }
  0x44   : > { %v155_v4 = vrot.slane %v154_v3, 2  ;;  %p403_p12 = pnand %p402_p8, %p717_p9  ;;  %s405_s10 = sshll.u32 %s502_s9, 4  ;;  %s406_s10 = int_to_ptr.vmem [resolvable:$false] %s405_s10 }
  0x45   : > { %s407_s4 = scalar_lea.vmem %s406_s10, 128  ;;  %p408_p7 = scmp.lt.s32.totalorder %s650_s18, %s406_s10 }
  0x46   : > { %v156_v5 = vmax.f32 %v154_v3, %v155_v4  ;;  %p404_p0 = pneg %p403_p12  ;;  %p409_p13 = scmp.lt.s32.totalorder %s407_s4, %s401_s2 }
  0x48   : > { %v157_v6 = vrot.slane %v156_v5, 1  ;;  %p410_p4 = por %p409_p13, %p408_p7 }
  0x4a   : > { %v158_v7 = vmax.f32 %v156_v5, %v157_v6  ;;  %p411_p6 = pnand %p410_p4, %p404_p0 }
  0x4c   : > { %v159_v8 = vsub.f32 %v150_v0, %v158_v7 }
  0x4e   : > { %v160_v9 = vmul.f32 1.442695, %v159_v8 }
  0x50   : > { %367 = vpow2.f32 %v160_v9 }
  0x5a   : > { %v368_v10 = vpop.eup %367 }
  0x5b   : > { %v162_v11 = vsel %vm151_vm0, %v368_v10, 0.0 }
  0x5c   : > { %v163_v12 = vrot.slane %v162_v11, 4 }
  0x5e   : > { %v164_v13 = vadd.f32 %v163_v12, %v162_v11 }
  0x60   : > { %v165_v14 = vrot.slane %v164_v13, 2 }
  0x62   : > { %v166_v15 = vadd.f32 %v165_v14, %v164_v13 }
  0x64   : > { %v167_v16 = vrot.slane %v166_v15, 1 }
  0x66   : > { %v168_v17 = vadd.f32 %v167_v16, %v166_v15 }
  0x68   : > { %369 = vrcp.f32 %v168_v17 }
  0x72   : > { %v370_v18 = vpop.eup %369 }
  0x73   : > { %v171_v19 = vmul.f32 %v370_v18, %v368_v10 }
  0x75   : > { %172 = vst [vmem:[%s149_s15] sm:$0xf] %v171_v19 }
  0x76   : > { %414 = shalt.err (!%p411_p6)
}
  0x77   : > { %s415_s5 = scalar_lea.hbm %s655_s30, 64  ;;  %s419_s20 = scalar_lea.hbm %s708_s1, 512 }
  0x78   : > { %p416_p3 = scmp.ne.s32.totalorder %s655_s30, %s415_s5  ;;  %p420_p1 = scmp.lt.u32.totalorder %s655_s30, %s708_s1 }
  0x79   : > { %p421_p2 = scmp.lt.u32.totalorder %s419_s20, %s415_s5  ;;  %p423_p8 = scmp.lt.u32.totalorder %s415_s5, %s655_s30 }
  0x7a   : > { %p417_p10 = pnand %p416_p3, %p717_p9 }
  0x7b   : > { %p422_p5 = por %p421_p2, %p420_p1 }
  0x7c   : > { %p418_p11 = pneg %p417_p10 }
  0x7d   : > { %p424_p12 = por %p423_p8, %p422_p5 }
  0x7f   : > { %p425_p0 = pnand %p424_p12, %p418_p11 }
  0x81   : > { %428 = shalt.err (!%p425_p0)
}
  0x82   : > { %291 = dma.vmem_to_hbm [thread:$0]  (%p717_p9), %s650_s18, 64, %s655_s30, %s174_s26  }
  0x83 PF: > { %p302_p7 = scmp.ge.s32.totalorder %s499_s13, 2  ;;  %s201_s3 = sand.u32 1, %s471_s6  }
  0x84   : > { %p718_p13 = scmp.ne.s32.totalorder %s713_s25, 0  ;;  %s202_s15 = scalar_lea.sflag [#allocation4], %s201_s3 }
  0x86   : > { %p298_p4 = pnand %p302_p7, %p718_p13 }
  0x88   : > { %466 = dma.done.wait (!%p298_p4), %s202_s15, 64  }
  0x89   : > { %468 = vsyncadd (!%p298_p4), %s202_s15, 4294967232  ;;  %s17_s13 = sadd.s32 1, %s499_s13   ;;  %s719_s6 = smov %s475_s7 }
  0x8a   : > { %p14_p6 = scmp.ge.s32.totalorder %s17_s13, 10   ;;  %s720_s7 = smov %s479_s8 }
  0x8b   : > { %s721_s8 = smov %s591_s27  ;;  %s722_s9 = smov %s491_s11 }
  0x8c   : > { %s723_s10 = smov %s495_s12  ;;  %s724_s11 = smov %s727_s16 }
  0x8d   : > { %s725_s12 = smov %s731_s17  ;;  %16 = sbr.rel (!%p14_p6) target bundleno = 7 (0x7), region = 69 }
  0x94   :  { %207 = vsyncpa [#allocation3], 1 }
  0x95   :  { %209 = vsyncpa [#allocation3 + $0x1], 1 }
  0x96   :  { %210 = vsyncpa [#allocation4], 1 }
  0x97   :  { %212 = vsyncpa [#allocation4 + $0x1], 1 }

</bundles_post_ra>
